<compile_context>
chip_gen: v7x
topology: tpu7x:2x2x1
jax: 0.10.0
libtpu: 0.0.40
codegen_flags: <defaults>
</compile_context>

<pallas_src>
import functools

import numpy as np
import jax
import jax.numpy as jnp
from jax.experimental import pallas as pl
from jax.experimental.pallas import tpu as pltpu

EPS = 1e-5


# ------------------------------- Pallas kernel ------------------------------ #

def _fused_forward_kernel(x_ref, masks_ref, w_ref, b_ref, o_ref,
                          xn_ref, cur_ref, *, W):
    """One grid step == one 'linear' layer (plus the preceding 'nonLinear').

    x_ref    : (C, NHW)         input, channels on sublanes / spatial on lanes
    masks_ref: (9, NHW)         3x3-tap validity masks (reproduce zero padding)
    w_ref    : (1, 9, Cout, C)  this layer's conv taps (dy-major, dx-minor)
    b_ref    : (1, Cout, 1)     this layer's conv bias
    o_ref    : (Cout, NHW)      final output (written on the last layer only)
    xn_ref   : (C, NHW)  VMEM   BN(x), computed once at step 0, reused
    cur_ref  : (Cout, NHW) VMEM layer-to-layer carry (previous conv output)
    """
    l = pl.program_id(0)
    C, NHW = xn_ref.shape
    Cout = cur_ref.shape[0]
    inv_n = 1.0 / float(NHW)                     # batch-stat count = N*H*W

    @pl.when(l == 0)
    def _init():
        # BN(x): training-mode batch stats, biased variance, single pass.
        x = x_ref[...]
        m = jnp.sum(x, axis=1, keepdims=True) * inv_n
        v = jnp.sum(x * x, axis=1, keepdims=True) * inv_n - m * m
        xn_ref[...] = (x - m) * jax.lax.rsqrt(v + EPS)
        # Zero carry: ReLU(0)=0 -> mean=0, var=0 -> BN contributes exactly 0,
        # reproducing layer 0's  conv0(BN0(x) + zeros_like(x)).
        cur_ref[...] = jnp.zeros_like(cur_ref)

    # nonLinear: BN(ReLU(prev)) with single-pass batch stats.
    p = jnp.maximum(cur_ref[...], 0.0)
    m = jnp.sum(p, axis=1, keepdims=True) * inv_n
    v = jnp.sum(p * p, axis=1, keepdims=True) * inv_n - m * m
    pn = (p - m) * jax.lax.rsqrt(v + EPS)

    # linear: conv3x3( BN(x) + BN(ReLU(prev)) ) + bias,
    # as 9 lane-shifted taps (pltpu.roll, XLU) feeding accumulated MXU matmuls.
    z = xn_ref[...] + pn                         # (C, NHW), lane dense
    w = w_ref[0]                                 # (9, Cout, C)
    masks = masks_ref[...]                       # (9, NHW), 0/1

    acc = jnp.zeros((Cout, NHW), jnp.float32)
    for dy in range(3):
        for dx in range(3):
            t = dy * 3 + dx
            off = (dy - 1) * W + (dx - 1)        # flat column shift
            if off == 0:
                tap = z                          # centre tap: no halo, mask==1
            else:
                tap = pltpu.roll(z, shift=(-off) % NHW, axis=1) * masks[t:t + 1, :]
            acc = acc + jnp.dot(w[t], tap, preferred_element_type=jnp.float32)

    out2d = acc + b_ref[0]                       # (Cout, NHW)
    cur_ref[...] = out2d                         # carry for the next layer

    @pl.when(l == pl.num_programs(0) - 1)
    def _finalize():
        o_ref[...] = out2d                       # single lane-dense HBM store


# ------------------------------- host wrapper ------------------------------- #

def _halo_masks(N, H, W):
    """(9, N*H*W) 0/1 masks: tap (dy,dx) is valid iff the shifted pixel is in-bounds
    (reproduces the 3x3 conv's zero padding in the flat column space)."""
    cols = np.arange(N * H * W)
    h = (cols // W) % H
    w = cols % W
    rows = []
    for dy in range(3):
        for dx in range(3):
            rows.append(((h + dy - 1 >= 0) & (h + dy - 1 < H) &
                         (w + dx - 1 >= 0) & (w + dx - 1 < W)).astype(np.float32))
    return np.stack(rows)


@functools.partial(jax.jit, static_argnames=("layers",))
def linear_tester_forward(x_nchw, w_stack, b_stack, layers=3):
    """x_nchw: (N,C,H,W); w_stack: (layers,Cout,Cin,3,3) PyTorch OIHW;
    b_stack: (layers,Cout).  Returns NCHW (N,Cout,H,W)."""
    N, C, H, W = x_nchw.shape
    L, Cout, Cin = w_stack.shape[:3]
    assert L == layers and Cin == C and Cout == C, "LinearTester requires inCh == outCh"
    NHW = N * H * W

    # Layout plumbing folded into this jit (done once, outside any layer loop).
    x2d = jnp.transpose(x_nchw.astype(jnp.float32), (1, 0, 2, 3)).reshape(C, NHW)
    # (layers, 9, Cout, Cin): tap-major weights matching the kernel's (dy, dx) loop.
    w9 = jnp.transpose(w_stack.astype(jnp.float32), (0, 3, 4, 1, 2)).reshape(layers, 9, Cout, Cin)
    b3 = b_stack.astype(jnp.float32).reshape(layers, Cout, 1)
    masks = jnp.asarray(_halo_masks(N, H, W))    # trace-time constant, (9, NHW)

    out2d = pl.pallas_call(
        functools.partial(_fused_forward_kernel, W=W),
        out_shape=jax.ShapeDtypeStruct((Cout, NHW), jnp.float32),
        grid_spec=pltpu.PrefetchScalarGridSpec(
            num_scalar_prefetch=0,
            grid=(layers,),
            in_specs=[
                pl.BlockSpec((C, NHW), lambda l: (0, 0)),                 # x (resident)
                pl.BlockSpec((9, NHW), lambda l: (0, 0)),                 # masks (resident)
                pl.BlockSpec((1, 9, Cout, Cin), lambda l: (l, 0, 0, 0)),  # per-layer weights
                pl.BlockSpec((1, Cout, 1), lambda l: (l, 0, 0)),          # per-layer bias
            ],
            out_specs=pl.BlockSpec((Cout, NHW), lambda l: (0, 0)),
            scratch_shapes=[
                pltpu.VMEM((C, NHW), jnp.float32),      # BN(x)
                pltpu.VMEM((Cout, NHW), jnp.float32),   # layer carry
            ],
        ),
        compiler_params=pltpu.CompilerParams(
            dimension_semantics=("arbitrary",)),        # layers are sequential
    )(x2d, masks, w9, b3)

    # (Cout, N*H*W) -> NCHW: one contiguous reshape + one tiny transpose, same jit.
    return jnp.transpose(out2d.reshape(Cout, N, H, W), (1, 0, 2, 3))


# ---------------------------- pure-JAX reference ---------------------------- #

def reference_forward(x_nchw, w_stack, b_stack, layers=3):
    def bn(v):
        m = jnp.mean(v, axis=(0, 2, 3), keepdims=True)
        var = jnp.mean((v - m) ** 2, axis=(0, 2, 3), keepdims=True)
        return (v - m) * jax.lax.rsqrt(var + EPS)

    def conv(v, w, b):
        o = jax.lax.conv_general_dilated(
            v, w, window_strides=(1, 1), padding=((1, 1), (1, 1)),
            dimension_numbers=("NCHW", "OIHW", "NCHW"))
        return o + b.reshape(1, -1, 1, 1)

    out = conv(bn(x_nchw), w_stack[0], b_stack[0])
    for i in range(1, layers):
        out = bn(jnp.maximum(out, 0.0))
        out = conv(bn(x_nchw) + out, w_stack[i], b_stack[i])
    return out


# ----------------------------------- main ----------------------------------- #

if __name__ == "__main__":
    layers = 3
    N, C, H, W = 2, 4, 16, 16            # input_size = output_size = (4, 16, 16)
    Cout = C

    key = jax.random.PRNGKey(0)
    k_x, k_w = jax.random.split(key)
    x = jax.random.normal(k_x, (N, C, H, W), jnp.float32)

    # kaiming_normal_(mode='fan_out', nonlinearity='relu'): std = sqrt(2/(Cout*9)); bias = 0.
    std = (2.0 / (Cout * 9)) ** 0.5
    w_stack = std * jax.random.normal(k_w, (layers, Cout, C, 3, 3), jnp.float32)
    b_stack = jnp.zeros((layers, Cout), jnp.float32)

    out = jax.block_until_ready(
        linear_tester_forward(x, w_stack, b_stack, layers=layers))
    assert out.shape == (N, Cout, H, W)

    ref = reference_forward(x, w_stack, b_stack, layers)
    err = float(jnp.max(jnp.abs(out - ref)))
    assert jnp.allclose(out, ref, rtol=5e-2, atol=5e-2), f"max abs err {err}"

    print("KERNEL_OK")
</pallas_src>

<mosaic_0001>
module attributes {stable_mosaic.version = 11 : i64} {
  func.func @_fused_forward_kernel(%arg0: i32, %arg1: memref<4x512xf32, #tpu.memory_space<vmem>>, %arg2: memref<9x512xf32, #tpu.memory_space<vmem>>, %arg3: memref<1x9x4x4xf32, #tpu.memory_space<vmem>>, %arg4: memref<1x4x1xf32, #tpu.memory_space<vmem>>, %arg5: memref<4x512xf32, #tpu.memory_space<vmem>>, %arg6: memref<4x512xf32, #tpu.memory_space<vmem>>, %arg7: memref<4x512xf32, #tpu.memory_space<vmem>>) attributes {dimension_semantics = [#tpu.dimension_semantics<arbitrary>], iteration_bounds = array<i64: 3>, scalar_prefetch = 0 : i64, scratch_operands = 2 : i64, tpu.core_type = #tpu.core_type<tc>, window_params = [{pipeline_mode = #tpu.pipeline_mode<synchronous>, transform_indices = @transform_0, window_bounds = array<i64: 4, 512>}, {pipeline_mode = #tpu.pipeline_mode<synchronous>, transform_indices = @transform_1, window_bounds = array<i64: 9, 512>}, {transform_indices = @transform_2, window_bounds = array<i64: 1, 9, 4, 4>}, {transform_indices = @transform_3, window_bounds = array<i64: 1, 4, 1>}, {pipeline_mode = #tpu.pipeline_mode<synchronous>, transform_indices = @transform_4, window_bounds = array<i64: 4, 512>}]} {
    %c0_i32 = arith.constant 0 : i32
    %0 = arith.cmpi eq, %arg0, %c0_i32 : i32
    %1 = arith.extui %0 : i1 to i32
    %c0_i32_0 = arith.constant 0 : i32
    %2 = arith.cmpi ne, %1, %c0_i32_0 : i32
    scf.if %2 {
      %c0_31 = arith.constant 0 : index
      %c0_32 = arith.constant 0 : index
      %106 = vector.load %arg1[%c0_31, %c0_32] : memref<4x512xf32, #tpu.memory_space<vmem>>, vector<4x512xf32>
      %cst_33 = arith.constant dense<0.000000e+00> : vector<4xf32>
      %107 = vector.multi_reduction <add>, %106, %cst_33 [1] : vector<4x512xf32> to vector<4xf32>
      %108 = vector.shape_cast %107 : vector<4xf32> to vector<4x1xf32>
      %cst_34 = arith.constant 0.001953125 : f32
      %109 = vector.broadcast %cst_34 : f32 to vector<4x1xf32>
      %110 = arith.mulf %108, %109 : vector<4x1xf32>
      %111 = arith.mulf %106, %106 : vector<4x512xf32>
      %cst_35 = arith.constant dense<0.000000e+00> : vector<4xf32>
      %112 = vector.multi_reduction <add>, %111, %cst_35 [1] : vector<4x512xf32> to vector<4xf32>
      %113 = vector.shape_cast %112 : vector<4xf32> to vector<4x1xf32>
      %cst_36 = arith.constant 0.001953125 : f32
      %114 = vector.broadcast %cst_36 : f32 to vector<4x1xf32>
      %115 = arith.mulf %113, %114 : vector<4x1xf32>
      %116 = arith.mulf %110, %110 : vector<4x1xf32>
      %117 = arith.subf %115, %116 : vector<4x1xf32>
      %118 = vector.broadcast %110 : vector<4x1xf32> to vector<4x512xf32>
      %119 = arith.subf %106, %118 : vector<4x512xf32>
      %cst_37 = arith.constant 9.99999974E-6 : f32
      %120 = vector.broadcast %cst_37 : f32 to vector<4x1xf32>
      %121 = arith.addf %117, %120 : vector<4x1xf32>
      %122 = math.rsqrt %121 : vector<4x1xf32>
      %123 = vector.broadcast %122 : vector<4x1xf32> to vector<4x512xf32>
      %124 = arith.mulf %119, %123 : vector<4x512xf32>
      %c0_38 = arith.constant 0 : index
      %c0_39 = arith.constant 0 : index
      %125 = vector.load %arg6[%c0_38, %c0_39] : memref<4x512xf32, #tpu.memory_space<vmem>>, vector<4x512xf32>
      tpu.vector_store %arg6[%c0_38, %c0_39], %124 {strides = array<i32>} : memref<4x512xf32, #tpu.memory_space<vmem>>, vector<4x512xf32>,
      %cst_40 = arith.constant 0.000000e+00 : f32
      %126 = vector.broadcast %cst_40 : f32 to vector<4x512xf32>
      %c0_41 = arith.constant 0 : index
      %c0_42 = arith.constant 0 : index
      %127 = vector.load %arg7[%c0_41, %c0_42] : memref<4x512xf32, #tpu.memory_space<vmem>>, vector<4x512xf32>
      tpu.vector_store %arg7[%c0_41, %c0_42], %126 {strides = array<i32>} : memref<4x512xf32, #tpu.memory_space<vmem>>, vector<4x512xf32>,
    } else {
    }
    %c0 = arith.constant 0 : index
    %c0_1 = arith.constant 0 : index
    %3 = vector.load %arg7[%c0, %c0_1] : memref<4x512xf32, #tpu.memory_space<vmem>>, vector<4x512xf32>
    %cst = arith.constant 0.000000e+00 : f32
    %4 = vector.broadcast %cst : f32 to vector<4x512xf32>
    %5 = arith.maximumf %3, %4 : vector<4x512xf32>
    %cst_2 = arith.constant dense<0.000000e+00> : vector<4xf32>
    %6 = vector.multi_reduction <add>, %5, %cst_2 [1] : vector<4x512xf32> to vector<4xf32>
    %7 = vector.shape_cast %6 : vector<4xf32> to vector<4x1xf32>
    %cst_3 = arith.constant 0.001953125 : f32
    %8 = vector.broadcast %cst_3 : f32 to vector<4x1xf32>
    %9 = arith.mulf %7, %8 : vector<4x1xf32>
    %10 = arith.mulf %5, %5 : vector<4x512xf32>
    %cst_4 = arith.constant dense<0.000000e+00> : vector<4xf32>
    %11 = vector.multi_reduction <add>, %10, %cst_4 [1] : vector<4x512xf32> to vector<4xf32>
    %12 = vector.shape_cast %11 : vector<4xf32> to vector<4x1xf32>
    %cst_5 = arith.constant 0.001953125 : f32
    %13 = vector.broadcast %cst_5 : f32 to vector<4x1xf32>
    %14 = arith.mulf %12, %13 : vector<4x1xf32>
    %15 = arith.mulf %9, %9 : vector<4x1xf32>
    %16 = arith.subf %14, %15 : vector<4x1xf32>
    %17 = vector.broadcast %9 : vector<4x1xf32> to vector<4x512xf32>
    %18 = arith.subf %5, %17 : vector<4x512xf32>
    %cst_6 = arith.constant 9.99999974E-6 : f32
    %19 = vector.broadcast %cst_6 : f32 to vector<4x1xf32>
    %20 = arith.addf %16, %19 : vector<4x1xf32>
    %21 = math.rsqrt %20 : vector<4x1xf32>
    %22 = vector.broadcast %21 : vector<4x1xf32> to vector<4x512xf32>
    %23 = arith.mulf %18, %22 : vector<4x512xf32>
    %c0_7 = arith.constant 0 : index
    %c0_8 = arith.constant 0 : index
    %24 = vector.load %arg6[%c0_7, %c0_8] : memref<4x512xf32, #tpu.memory_space<vmem>>, vector<4x512xf32>
    %25 = arith.addf %24, %23 : vector<4x512xf32>
    %c0_9 = arith.constant 0 : index
    %c0_10 = arith.constant 0 : index
    %c0_11 = arith.constant 0 : index
    %c0_12 = arith.constant 0 : index
    %26 = vector.load %arg3[%c0_9, %c0_10, %c0_11, %c0_12] : memref<1x9x4x4xf32, #tpu.memory_space<vmem>>, vector<1x9x4x4xf32>
    %27 = vector.shape_cast %26 : vector<1x9x4x4xf32> to vector<9x4x4xf32>
    %c0_13 = arith.constant 0 : index
    %c0_14 = arith.constant 0 : index
    %28 = vector.load %arg2[%c0_13, %c0_14] : memref<9x512xf32, #tpu.memory_space<vmem>>, vector<9x512xf32>
    %cst_15 = arith.constant 0.000000e+00 : f32
    %29 = vector.broadcast %cst_15 : f32 to vector<4x512xf32>
    %c17_i32 = arith.constant 17 : i32
    %30 = tpu.dynamic_rotate %25 by %c17_i32 dim 1 : vector<4x512xf32>, i32 -> vector<4x512xf32>
    %31 = vector.extract_strided_slice %28 {offsets = [0, 0], sizes = [1, 512], strides = [1, 1]} : vector<9x512xf32> to vector<1x512xf32>
    %32 = vector.broadcast %31 : vector<1x512xf32> to vector<4x512xf32>
    %33 = arith.mulf %30, %32 : vector<4x512xf32>
    %34 = vector.extract_strided_slice %27 {offsets = [0, 0, 0], sizes = [1, 4, 4], strides = [1, 1, 1]} : vector<9x4x4xf32> to vector<1x4x4xf32>
    %35 = vector.shape_cast %34 : vector<1x4x4xf32> to vector<4x4xf32>
    %cst_16 = arith.constant dense<0.000000e+00> : vector<4x512xf32>
    %36 = tpu.matmul %35, %33, %cst_16 {dimension_numbers = #tpu.dot_dimension_numbers<[1], [0], [0], [1], [0, 0, 1, 1], [], []>} : vector<4x4xf32>, vector<4x512xf32>, vector<4x512xf32> -> vector<4x512xf32>
    %37 = arith.addf %29, %36 : vector<4x512xf32>
    %c16_i32 = arith.constant 16 : i32
    %38 = tpu.dynamic_rotate %25 by %c16_i32 dim 1 : vector<4x512xf32>, i32 -> vector<4x512xf32>
    %39 = vector.extract_strided_slice %28 {offsets = [1, 0], sizes = [1, 512], strides = [1, 1]} : vector<9x512xf32> to vector<1x512xf32>
    %40 = vector.broadcast %39 : vector<1x512xf32> to vector<4x512xf32>
    %41 = arith.mulf %38, %40 : vector<4x512xf32>
    %42 = vector.extract_strided_slice %27 {offsets = [1, 0, 0], sizes = [1, 4, 4], strides = [1, 1, 1]} : vector<9x4x4xf32> to vector<1x4x4xf32>
    %43 = vector.shape_cast %42 : vector<1x4x4xf32> to vector<4x4xf32>
    %cst_17 = arith.constant dense<0.000000e+00> : vector<4x512xf32>
    %44 = tpu.matmul %43, %41, %cst_17 {dimension_numbers = #tpu.dot_dimension_numbers<[1], [0], [0], [1], [0, 0, 1, 1], [], []>} : vector<4x4xf32>, vector<4x512xf32>, vector<4x512xf32> -> vector<4x512xf32>
    %45 = arith.addf %37, %44 : vector<4x512xf32>
    %c15_i32 = arith.constant 15 : i32
    %46 = tpu.dynamic_rotate %25 by %c15_i32 dim 1 : vector<4x512xf32>, i32 -> vector<4x512xf32>
    %47 = vector.extract_strided_slice %28 {offsets = [2, 0], sizes = [1, 512], strides = [1, 1]} : vector<9x512xf32> to vector<1x512xf32>
    %48 = vector.broadcast %47 : vector<1x512xf32> to vector<4x512xf32>
    %49 = arith.mulf %46, %48 : vector<4x512xf32>
    %50 = vector.extract_strided_slice %27 {offsets = [2, 0, 0], sizes = [1, 4, 4], strides = [1, 1, 1]} : vector<9x4x4xf32> to vector<1x4x4xf32>
    %51 = vector.shape_cast %50 : vector<1x4x4xf32> to vector<4x4xf32>
    %cst_18 = arith.constant dense<0.000000e+00> : vector<4x512xf32>
    %52 = tpu.matmul %51, %49, %cst_18 {dimension_numbers = #tpu.dot_dimension_numbers<[1], [0], [0], [1], [0, 0, 1, 1], [], []>} : vector<4x4xf32>, vector<4x512xf32>, vector<4x512xf32> -> vector<4x512xf32>
    %53 = arith.addf %45, %52 : vector<4x512xf32>
    %c1_i32 = arith.constant 1 : i32
    %54 = tpu.dynamic_rotate %25 by %c1_i32 dim 1 : vector<4x512xf32>, i32 -> vector<4x512xf32>
    %55 = vector.extract_strided_slice %28 {offsets = [3, 0], sizes = [1, 512], strides = [1, 1]} : vector<9x512xf32> to vector<1x512xf32>
    %56 = vector.broadcast %55 : vector<1x512xf32> to vector<4x512xf32>
    %57 = arith.mulf %54, %56 : vector<4x512xf32>
    %58 = vector.extract_strided_slice %27 {offsets = [3, 0, 0], sizes = [1, 4, 4], strides = [1, 1, 1]} : vector<9x4x4xf32> to vector<1x4x4xf32>
    %59 = vector.shape_cast %58 : vector<1x4x4xf32> to vector<4x4xf32>
    %cst_19 = arith.constant dense<0.000000e+00> : vector<4x512xf32>
    %60 = tpu.matmul %59, %57, %cst_19 {dimension_numbers = #tpu.dot_dimension_numbers<[1], [0], [0], [1], [0, 0, 1, 1], [], []>} : vector<4x4xf32>, vector<4x512xf32>, vector<4x512xf32> -> vector<4x512xf32>
    %61 = arith.addf %53, %60 : vector<4x512xf32>
    %62 = vector.extract_strided_slice %27 {offsets = [4, 0, 0], sizes = [1, 4, 4], strides = [1, 1, 1]} : vector<9x4x4xf32> to vector<1x4x4xf32>
    %63 = vector.shape_cast %62 : vector<1x4x4xf32> to vector<4x4xf32>
    %cst_20 = arith.constant dense<0.000000e+00> : vector<4x512xf32>
    %64 = tpu.matmul %63, %25, %cst_20 {dimension_numbers = #tpu.dot_dimension_numbers<[1], [0], [0], [1], [0, 0, 1, 1], [], []>} : vector<4x4xf32>, vector<4x512xf32>, vector<4x512xf32> -> vector<4x512xf32>
    %65 = arith.addf %61, %64 : vector<4x512xf32>
    %c511_i32 = arith.constant 511 : i32
    %66 = tpu.dynamic_rotate %25 by %c511_i32 dim 1 : vector<4x512xf32>, i32 -> vector<4x512xf32>
    %67 = vector.extract_strided_slice %28 {offsets = [5, 0], sizes = [1, 512], strides = [1, 1]} : vector<9x512xf32> to vector<1x512xf32>
    %68 = vector.broadcast %67 : vector<1x512xf32> to vector<4x512xf32>
    %69 = arith.mulf %66, %68 : vector<4x512xf32>
    %70 = vector.extract_strided_slice %27 {offsets = [5, 0, 0], sizes = [1, 4, 4], strides = [1, 1, 1]} : vector<9x4x4xf32> to vector<1x4x4xf32>
    %71 = vector.shape_cast %70 : vector<1x4x4xf32> to vector<4x4xf32>
    %cst_21 = arith.constant dense<0.000000e+00> : vector<4x512xf32>
    %72 = tpu.matmul %71, %69, %cst_21 {dimension_numbers = #tpu.dot_dimension_numbers<[1], [0], [0], [1], [0, 0, 1, 1], [], []>} : vector<4x4xf32>, vector<4x512xf32>, vector<4x512xf32> -> vector<4x512xf32>
    %73 = arith.addf %65, %72 : vector<4x512xf32>
    %c497_i32 = arith.constant 497 : i32
    %74 = tpu.dynamic_rotate %25 by %c497_i32 dim 1 : vector<4x512xf32>, i32 -> vector<4x512xf32>
    %75 = vector.extract_strided_slice %28 {offsets = [6, 0], sizes = [1, 512], strides = [1, 1]} : vector<9x512xf32> to vector<1x512xf32>
    %76 = vector.broadcast %75 : vector<1x512xf32> to vector<4x512xf32>
    %77 = arith.mulf %74, %76 : vector<4x512xf32>
    %78 = vector.extract_strided_slice %27 {offsets = [6, 0, 0], sizes = [1, 4, 4], strides = [1, 1, 1]} : vector<9x4x4xf32> to vector<1x4x4xf32>
    %79 = vector.shape_cast %78 : vector<1x4x4xf32> to vector<4x4xf32>
    %cst_22 = arith.constant dense<0.000000e+00> : vector<4x512xf32>
    %80 = tpu.matmul %79, %77, %cst_22 {dimension_numbers = #tpu.dot_dimension_numbers<[1], [0], [0], [1], [0, 0, 1, 1], [], []>} : vector<4x4xf32>, vector<4x512xf32>, vector<4x512xf32> -> vector<4x512xf32>
    %81 = arith.addf %73, %80 : vector<4x512xf32>
    %c496_i32 = arith.constant 496 : i32
    %82 = tpu.dynamic_rotate %25 by %c496_i32 dim 1 : vector<4x512xf32>, i32 -> vector<4x512xf32>
    %83 = vector.extract_strided_slice %28 {offsets = [7, 0], sizes = [1, 512], strides = [1, 1]} : vector<9x512xf32> to vector<1x512xf32>
    %84 = vector.broadcast %83 : vector<1x512xf32> to vector<4x512xf32>
    %85 = arith.mulf %82, %84 : vector<4x512xf32>
    %86 = vector.extract_strided_slice %27 {offsets = [7, 0, 0], sizes = [1, 4, 4], strides = [1, 1, 1]} : vector<9x4x4xf32> to vector<1x4x4xf32>
    %87 = vector.shape_cast %86 : vector<1x4x4xf32> to vector<4x4xf32>
    %cst_23 = arith.constant dense<0.000000e+00> : vector<4x512xf32>
    %88 = tpu.matmul %87, %85, %cst_23 {dimension_numbers = #tpu.dot_dimension_numbers<[1], [0], [0], [1], [0, 0, 1, 1], [], []>} : vector<4x4xf32>, vector<4x512xf32>, vector<4x512xf32> -> vector<4x512xf32>
    %89 = arith.addf %81, %88 : vector<4x512xf32>
    %c495_i32 = arith.constant 495 : i32
    %90 = tpu.dynamic_rotate %25 by %c495_i32 dim 1 : vector<4x512xf32>, i32 -> vector<4x512xf32>
    %91 = vector.extract_strided_slice %28 {offsets = [8, 0], sizes = [1, 512], strides = [1, 1]} : vector<9x512xf32> to vector<1x512xf32>
    %92 = vector.broadcast %91 : vector<1x512xf32> to vector<4x512xf32>
    %93 = arith.mulf %90, %92 : vector<4x512xf32>
    %94 = vector.extract_strided_slice %27 {offsets = [8, 0, 0], sizes = [1, 4, 4], strides = [1, 1, 1]} : vector<9x4x4xf32> to vector<1x4x4xf32>
    %95 = vector.shape_cast %94 : vector<1x4x4xf32> to vector<4x4xf32>
    %cst_24 = arith.constant dense<0.000000e+00> : vector<4x512xf32>
    %96 = tpu.matmul %95, %93, %cst_24 {dimension_numbers = #tpu.dot_dimension_numbers<[1], [0], [0], [1], [0, 0, 1, 1], [], []>} : vector<4x4xf32>, vector<4x512xf32>, vector<4x512xf32> -> vector<4x512xf32>
    %97 = arith.addf %89, %96 : vector<4x512xf32>
    %c0_25 = arith.constant 0 : index
    %c0_26 = arith.constant 0 : index
    %c0_27 = arith.constant 0 : index
    %98 = vector.load %arg4[%c0_25, %c0_26, %c0_27] : memref<1x4x1xf32, #tpu.memory_space<vmem>>, vector<1x4x1xf32>
    %99 = vector.shape_cast %98 : vector<1x4x1xf32> to vector<4x1xf32>
    %100 = vector.broadcast %99 : vector<4x1xf32> to vector<4x512xf32>
    %101 = arith.addf %97, %100 : vector<4x512xf32>
    %c0_28 = arith.constant 0 : index
    %c0_29 = arith.constant 0 : index
    %102 = vector.load %arg7[%c0_28, %c0_29] : memref<4x512xf32, #tpu.memory_space<vmem>>, vector<4x512xf32>
    tpu.vector_store %arg7[%c0_28, %c0_29], %101 {strides = array<i32>} : memref<4x512xf32, #tpu.memory_space<vmem>>, vector<4x512xf32>,
    %c2_i32 = arith.constant 2 : i32
    %103 = arith.cmpi eq, %arg0, %c2_i32 : i32
    %104 = arith.extui %103 : i1 to i32
    %c0_i32_30 = arith.constant 0 : i32
    %105 = arith.cmpi ne, %104, %c0_i32_30 : i32
    scf.if %105 {
      %c0_31 = arith.constant 0 : index
      %c0_32 = arith.constant 0 : index
      %106 = vector.load %arg5[%c0_31, %c0_32] : memref<4x512xf32, #tpu.memory_space<vmem>>, vector<4x512xf32>
      tpu.vector_store %arg5[%c0_31, %c0_32], %101 {strides = array<i32>} : memref<4x512xf32, #tpu.memory_space<vmem>>, vector<4x512xf32>,
    } else {
    }
    return
  }
  func.func @transform_0(%arg0: i32) -> (i32, i32) {
    %c0_i32 = arith.constant 0 : i32
    %c0_i32_0 = arith.constant 0 : i32
    %c0_i32_1 = arith.constant 0 : i32
    return %c0_i32, %c0_i32_0 : i32, i32
  }
  func.func @transform_1(%arg0: i32) -> (i32, i32) {
    %c0_i32 = arith.constant 0 : i32
    %c0_i32_0 = arith.constant 0 : i32
    %c0_i32_1 = arith.constant 0 : i32
    return %c0_i32, %c0_i32_0 : i32, i32
  }
  func.func @transform_2(%arg0: i32) -> (i32, i32, i32, i32) {
    %c0_i32 = arith.constant 0 : i32
    %c0_i32_0 = arith.constant 0 : i32
    %c0_i32_1 = arith.constant 0 : i32
    %c0_i32_2 = arith.constant 0 : i32
    return %arg0, %c0_i32, %c0_i32_0, %c0_i32_1 : i32, i32, i32, i32
  }
  func.func @transform_3(%arg0: i32) -> (i32, i32, i32) {
    %c0_i32 = arith.constant 0 : i32
    %c0_i32_0 = arith.constant 0 : i32
    %c0_i32_1 = arith.constant 0 : i32
    return %arg0, %c0_i32, %c0_i32_0 : i32, i32, i32
  }
  func.func @transform_4(%arg0: i32) -> (i32, i32) {
    %c0_i32 = arith.constant 0 : i32
    %c0_i32_0 = arith.constant 0 : i32
    %c0_i32_1 = arith.constant 0 : i32
    return %c0_i32, %c0_i32_0 : i32, i32
  }
}

</mosaic_0001>

<bundles_post_ra>
// kernel: linear_tester_forward.1
= control target key start
LH: loop header
LB: loop body
LE: loop exit
PB: predicated region body
PF: predicated region fallthrough
CT: control target
= control target key end

     0   :  { %s2309_s15 = smov 0   ;;  %s2664_s0 = inlined_call_operand.vmem [shape: f32[4,512], index: 0, kind: input, shape index: {}]   ;;  %s2665_s1 = inlined_call_operand.vmem [shape: f32[9,512], index: 1, kind: input, shape index: {}]   ;;  %s2666_s2 = inlined_call_operand.vmem [shape: f32[3,9,4,4], index: 2, kind: input, shape index: {}]   ;;  %s2667_s3 = inlined_call_operand.vmem [shape: f32[3,4,1], index: 3, kind: input, shape index: {}]   ;;  %s2668_s4 = inlined_call_operand.vmem [shape: f32[4,512], index: 4, kind: output, shape index: {}]  }
   0x1 LB: > { %s2315_s16 = sadd.s32 4294967295, %s2269_s15   ;;  %p2136_p0 = scmp.ge.s32.totalorder %s2269_s15, 1  ;;  %s2269_s15 = sphi %s2309_s15, %s14_s15  }
   0x2   : > { %p166_p1 = scmp.lt.s32.totalorder %s2269_s15, 4 }
   0x4   : > { %p167_p2 = pnand %p2136_p0, %p166_p1 }
   0x5   : > { %p191_p3 = scmp.lt.s32.totalorder (!%p167_p2), %s2315_s16, 2  ;;  %p2139_p4 = scmp.ne.s32.totalorder (!%p167_p2), %s2315_s16, 0 }
   0x6   : > { %170 = sbr.rel (%p167_p2) target bundleno = 792 (0x318), region = 36 }
   0xd   : > { %s192_s17 = scalar_select %p191_p3, %s2315_s16, 2 }
   0xe   : > { %203 = sbr.rel (%p2139_p4) target bundleno = 192 (0xc0), region = 40  ;;  %v204_v0 = vld [vmem:[%s2664_s0] sm:$0xff] (!%p2139_p4)  ;;  %v205_v1 = vld [vmem:[%s2664_s0 + $0x8] sm:$0xff] (!%p2139_p4)  ;;  %vm212_vm0 = vcmask (!%p2139_p4), 1043456   ;;  %v2271_v22 = vmov (!%p2139_p4), 0.0   ;;  %v247_v30 = vlaneseq (!%p2139_p4) }
   0xf   : > { %s2233_s18 = smul.u32 36, %s192_s17  ;;  %s2138_s19 = sshll.u32 %s192_s17, 2  ;;  %v208_v2 = vcombine.high (!%p2139_p4), %v204_v0, %v204_v0  ;;  %v209_v3 = vcombine.high (!%p2139_p4), %v205_v1, %v205_v1  ;;  %v213_v4 = vsel (!%p2139_p4), %vm212_vm0, %v204_v0, 0.0  ;;  %v223_v5 = vmul.f32 (!%p2139_p4), %v204_v0, %v204_v0  ;;  %269 = vst [vmem:[#allocation3] sm:$0xff] (!%p2139_p4), %v2271_v22  ;;  %270 = vst [vmem:[#allocation3 + $0x8] sm:$0xff] (!%p2139_p4), %v2271_v22 }
  0x10   : > { %s2324_s22 = scalar_lea.vmem %s2667_s3, %s2138_s19  ;;  %v224_v6 = vmul.f32 (!%p2139_p4), %v205_v1, %v205_v1  ;;  %v216_v8 = vsel (!%p2139_p4), %vm212_vm0, %v205_v1, 0.0  ;;  %v2272_v28 = vmov (!%p2139_p4), 839922192   ;;  %v248_v34 = vshrl.u32 (!%p2139_p4), %v247_v30, 7 }
  0x11   : > { %s2329_s25 = scalar_lea.vmem %s2666_s2, %s2233_s18  ;;  %v214_v7 = vsel (!%p2139_p4), %vm212_vm0, %v208_v2, 0.0  ;;  %v227_v10 = vcombine.high (!%p2139_p4), %v223_v5, %v223_v5  ;;  %v231_v12 = vsel (!%p2139_p4), %vm212_vm0, %v223_v5, 0.0  ;;  %v218_v13 = vsel (!%p2139_p4), %vm212_vm0, %v209_v3, 0.0 }
  0x12   : > { %v215_v9 = vadd.f32 (!%p2139_p4), %v214_v7, %v213_v4  ;;  %v228_v11 = vcombine.high (!%p2139_p4), %v224_v6, %v224_v6  ;;  %v234_v16 = vsel (!%p2139_p4), %vm212_vm0, %v224_v6, 0.0  ;;  %v245_v29 = vunpack.c.l.s4 (!%p2139_p4), %v2272_v28 }
  0x13   : > { %v232_v15 = vsel (!%p2139_p4), %vm212_vm0, %v227_v10, 0.0 }
  0x14   : > { %v217_v14 = vadd.f32 (!%p2139_p4), %v216_v8, %v215_v9  ;;  %v233_v17 = vadd.f32 (!%p2139_p4), %v232_v15, %v231_v12  ;;  %v236_v19 = vsel (!%p2139_p4), %vm212_vm0, %v228_v11, 0.0  ;;  %v246_v33 = vunpack.c.0.s8 (!%p2139_p4), %v245_v29 }
  0x16   : > { %v219_v18 = vadd.f32 %v218_v13, %v217_v14  ;;  %v235_v20 = vadd.f32 %v234_v16, %v233_v17  ;;  %v249_v35 = vsub.s32 %v246_v33, %v248_v34 }
  0x18   : > { %220 = vadd.xlane.f32.xlu0 %v219_v18  ;;  %v237_v21 = vadd.f32 %v236_v19, %v235_v20 }
  0x1c   : > { %238 = vadd.xlane.f32.xlu0 %v237_v21 }
  0xa5   : > { %v221_v23 = vpop.xlane.xlu0 %220 }
  0xa6   : > { %v222_v24 = vmul.f32 0.001953125, %v221_v23 }
  0xa8   : > { %v241_v26 = vmul.f32 %v222_v24, %v222_v24  ;;  %v250_v36 = vrot.slane %v222_v24, %v249_v35 }
  0xa9   : > { %v239_v25 = vpop.xlane.xlu0 %238 }
  0xaa   : > { %v240_v27 = vmul.f32 0.001953125, %v239_v25  ;;  %v252_v38 = vsub.f32 %v204_v0, %v250_v36  ;;  %v253_v39 = vsub.f32 %v205_v1, %v250_v36 }
  0xac   : > { %v242_v31 = vsub.f32 %v240_v27, %v241_v26 }
  0xae   : > { %v254_v32 = vadd.f32 1e-05, %v242_v31 }
  0xb0   : > { %2257 = vrsqrt.f32 %v254_v32 }
  0xba   : > { %v2258_v37 = vpop.eup %2257 }
  0xbb   : > { %v263_v40 = vrot.slane %v2258_v37, %v249_v35 }
  0xbd   : > { %v265_v41 = vmul.f32 %v263_v40, %v252_v38  ;;  %v266_v42 = vmul.f32 %v263_v40, %v253_v39 }
  0xbf   : > { %267 = vst [vmem:[#allocation2] sm:$0xff] %v265_v41  ;;  %268 = vst [vmem:[#allocation2 + $0x8] sm:$0xff] %v266_v42 }
  0xc0 PF: > { %vm281_vm1 = vcmask 1043456   ;;  %v2273_v8 = vmov 839922192   ;;  %v316_v10 = vlaneseq  ;;  %s2274_s30 = smov 16   ;;  %s2275_s5 = smov 17   ;;  %v2277_v28 = vmov 0.0  }
  0xc1   : > { %v271_v43 = vld [vmem:[#allocation3] sm:$0xff]  ;;  %v272_v44 = vld [vmem:[#allocation3 + $0x8] sm:$0xff]  ;;  %v314_v9 = vunpack.c.l.s4 %v2273_v8  ;;  %s2276_s6 = smov 15   ;;  %511 = vmatprep.mubr.f32.mxu0 %v2277_v28  ;;  %582 = vmatprep.mubr.f32.mxu1 %v2277_v28  ;;  %s2278_s7 = smov 1   ;;  %v2283_v30 = vmov 0   ;;  %v2414_v38 = vld [vmem:[%s2665_s1 + $0x8] sm:$0xff] }
  0xc2   : > { %v273_v45 = vmax.f32 %v271_v43, 0.0  ;;  %v274_v46 = vmax.f32 %v272_v44, 0.0  ;;  %v2355_v14 = vshrl.u32 %v316_v10, 7  ;;  %s2279_s8 = smov 127   ;;  %s2280_s9 = smov 113   ;;  %2259 = vset.pattern.permute.xlu1 %v2283_v30  ;;  %2260 = vset.pattern.permute.xlu0 %v2283_v30  ;;  %v2408_v36 = vand.u32 127, %v316_v10 }
  0xc3   : > { %v315_v13 = vunpack.c.0.s8 %v314_v9  ;;  %s2281_s10 = smov 112   ;;  %s2282_s11 = smov 111   ;;  %v2067_v31 = vld [vmem:[%s2324_s22] sm:$0xf]  ;;  %v2428_v43 = vld [vmem:[%s2665_s1 + $0x18] sm:$0xff]  ;;  %v2433_v44 = vld [vmem:[%s2665_s1 + $0x10] sm:$0xff] }
  0xc4   : > { %v277_v47 = vcombine.high %v273_v45, %v273_v45  ;;  %v278_v48 = vcombine.high %v274_v46, %v274_v46  ;;  %v282_v49 = vsel %vm281_vm1, %v273_v45, 0.0  ;;  %v292_v50 = vmul.f32 %v273_v45, %v273_v45  ;;  %v2423_v42 = vld [vmem:[%s2665_s1] sm:$0xff]  ;;  %p2198_p5 = scmp.ne.s32.totalorder %s2315_s16, 2 }
  0xc5   : > { %v293_v51 = vmul.f32 %v274_v46, %v274_v46  ;;  %v285_v53 = vsel %vm281_vm1, %v274_v46, 0.0  ;;  %v318_v15 = vsub.s32 %v315_v13, %v2355_v14  ;;  %v413_v37 = vsub.s32 1, %v2355_v14 }
  0xc6   : > { %v283_v52 = vsel %vm281_vm1, %v277_v47, 0.0  ;;  %v296_v55 = vcombine.high %v292_v50, %v292_v50  ;;  %v300_v57 = vsel %vm281_vm1, %v292_v50, 0.0  ;;  %v287_v58 = vsel %vm281_vm1, %v278_v48, 0.0  ;;  %v336_v21 = vld [vmem:[#allocation2] sm:$0xff]  ;;  %v337_v22 = vld [vmem:[#allocation2 + $0x8] sm:$0xff] }
  0xc7   : > { %v284_v54 = vadd.f32 %v283_v52, %v282_v49  ;;  %v297_v56 = vcombine.high %v293_v51, %v293_v51  ;;  %v303_v61 = vsel %vm281_vm1, %v293_v51, 0.0  ;;  %vm406_vm2 = vcmp.lt.s32.totalorder %v2408_v36, 16 }
  0xc8   : > { %v301_v60 = vsel %vm281_vm1, %v296_v55, 0.0  ;;  %v418_v41 = vrot.slane %v2414_v38, %v413_v37  ;;  %v414_v49 = vrot.slane %v2423_v42, %v413_v37  ;;  %v426_v50 = vrot.slane %v2428_v43, %v413_v37 }
  0xc9   : > { %v286_v59 = vadd.f32 %v285_v53, %v284_v54  ;;  %v302_v62 = vadd.f32 %v301_v60, %v300_v57  ;;  %v305_v0 = vsel %vm281_vm1, %v297_v56, 0.0  ;;  %v380_v51 = vsub.s32 0, %v2355_v14  ;;  %v341_v60 = vld [vmem:[%s2329_s25 + $0x4] sm:$0xf] }
  0xca   : > { %v422_v52 = vrot.slane %v2433_v44, %v413_v37  ;;  %vm373_vm3 = vcmp.lt.s32.totalorder %v2408_v36, 17  ;;  %vm431_vm4 = vcmask 31744   ;;  %vm754_vm5 = vcmp.lt.s32.totalorder %v2408_v36, 15 }
  0xcb   : > { %v288_v63 = vadd.f32 %v287_v58, %v286_v59  ;;  %v304_v1 = vadd.f32 %v303_v61, %v302_v62  ;;  %v385_v59 = vrot.slane %v2414_v38, %v380_v51  ;;  %v955_v30 = vsub.s32 3, %v2355_v14 }
  0xcc   : > { %vm948_vm6 = vcmp.lt.s32.totalorder %v2408_v36, 1  ;;  %vm1299_vm7 = vcmp.lt.s32.totalorder %v2408_v36, 127  ;;  %vm1493_vm8 = vcmp.lt.s32.totalorder %v2408_v36, 113  ;;  %vm1687_vm9 = vcmp.lt.s32.totalorder %v2408_v36, 112 }
  0xcd   : > { %289 = vadd.xlane.f32.xlu0 %v288_v63  ;;  %v306_v2 = vadd.f32 %v305_v0, %v304_v1  ;;  %vm1881_vm10 = vcmp.lt.s32.totalorder %v2408_v36, 111  ;;  %v348_v36 = vld [vmem:[%s2329_s25 + $0x20] sm:$0xf] }
  0xd1   : > { %307 = vadd.xlane.f32.xlu0 %v306_v2  ;;  %v381_v2 = vrot.slane %v2423_v42, %v380_v51 }
 0x15a   : > { %v290_v3 = vpop.xlane.xlu0 %289 }
 0x15b   : > { %v291_v4 = vmul.f32 0.001953125, %v290_v3  ;;  %v393_v3 = vrot.slane %v2428_v43, %v380_v51 }
 0x15d   : > { %v310_v6 = vmul.f32 %v291_v4, %v291_v4  ;;  %v319_v16 = vrot.slane %v291_v4, %v318_v15  ;;  %v761_v4 = vsub.s32 2, %v2355_v14 }
 0x15e   : > { %v308_v5 = vpop.xlane.xlu0 %307 }
 0x15f   : > { %v309_v7 = vmul.f32 0.001953125, %v308_v5  ;;  %v321_v18 = vsub.f32 %v273_v45, %v319_v16  ;;  %v322_v19 = vsub.f32 %v274_v46, %v319_v16  ;;  %v389_v5 = vrot.slane %v2433_v44, %v380_v51  ;;  %v340_v16 = vld [vmem:[%s2329_s25] sm:$0xf] }
 0x160   : > { %v762_v13 = vrot.slane %v2423_v42, %v761_v4 }
 0x161   : > { %v311_v11 = vsub.f32 %v309_v7, %v310_v6 }
 0x163   : > { %v323_v12 = vadd.f32 1e-05, %v311_v11 }
 0x165   : > { %2261 = vrsqrt.f32 %v323_v12 }
 0x16f   : > { %v2262_v17 = vpop.eup %2261 }
 0x170   : > { %v332_v20 = vrot.slane %v2262_v17, %v318_v15  ;;  %v766_v15 = vrot.slane %v2414_v38, %v761_v4 }
 0x172   : > { %v334_v23 = vmul.f32 %v332_v20, %v321_v18  ;;  %v335_v24 = vmul.f32 %v332_v20, %v322_v19 }
 0x174   : > { %v2358_v25 = vadd.f32 %v336_v21, %v334_v23  ;;  %v2360_v26 = vadd.f32 %v337_v22, %v335_v24  ;;  %v770_v21 = vrot.slane %v2433_v44, %v761_v4  ;;  %v774_v24 = vrot.slane %v2428_v43, %v761_v4 }
 0x176   : > { %402 = vrot.lane.b32.xlu0 %v2360_v26, %s2274_s30  ;;  %398 = vrot.lane.b32.xlu1 %v2358_v25, %s2274_s30  ;;  %v2366_v27 = vcombine.high %v2358_v25, %v2358_v25  ;;  %v2374_v29 = vcombine.high %v2360_v26, %v2360_v26 }
 0x17a   : > { %363 = vrot.lane.b32.xlu1 %v2358_v25, %s2275_s5  ;;  %748 = vrot.lane.b32.xlu0 %v2366_v27, %s2276_s6 }
 0x17e   : > { %367 = vrot.lane.b32.xlu1 %v2360_v26, %s2275_s5  ;;  %752 = vrot.lane.b32.xlu0 %v2374_v29, %s2276_s6 }
 0x182   : > { %942 = vrot.lane.b32.xlu0 %v2366_v27, %s2278_s7  ;;  %400 = vrot.lane.b32.xlu1 %v2366_v27, %s2274_s30 }
 0x186   : > { %946 = vrot.lane.b32.xlu0 %v2374_v29, %s2278_s7  ;;  %404 = vrot.lane.b32.xlu1 %v2374_v29, %s2274_s30 }
 0x18a   : > { %1293 = vrot.lane.b32.xlu0 %v2366_v27, %s2279_s8  ;;  %365 = vrot.lane.b32.xlu1 %v2366_v27, %s2275_s5 }
 0x18e   : > { %1297 = vrot.lane.b32.xlu0 %v2374_v29, %s2279_s8  ;;  %369 = vrot.lane.b32.xlu1 %v2374_v29, %s2275_s5 }
 0x192   : > { %1487 = vrot.lane.b32.xlu0 %v2366_v27, %s2280_s9  ;;  %746 = vrot.lane.b32.xlu1 %v2358_v25, %s2276_s6 }
 0x196   : > { %1491 = vrot.lane.b32.xlu0 %v2374_v29, %s2280_s9  ;;  %750 = vrot.lane.b32.xlu1 %v2360_v26, %s2276_s6 }
 0x19a   : > { %1681 = vrot.lane.b32.xlu0 %v2366_v27, %s2281_s10  ;;  %940 = vrot.lane.b32.xlu1 %v2358_v25, %s2278_s7 }
 0x19e   : > { %1685 = vrot.lane.b32.xlu0 %v2374_v29, %s2281_s10  ;;  %944 = vrot.lane.b32.xlu1 %v2360_v26, %s2278_s7 }
 0x1a2   : > { %1875 = vrot.lane.b32.xlu0 %v2366_v27, %s2282_s11  ;;  %1291 = vrot.lane.b32.xlu1 %v2358_v25, %s2279_s8 }
 0x1a6   : > { %1879 = vrot.lane.b32.xlu0 %v2374_v29, %s2282_s11  ;;  %1295 = vrot.lane.b32.xlu1 %v2360_v26, %s2279_s8 }
 0x1aa   : > { %1485 = vrot.lane.b32.xlu1 %v2358_v25, %s2280_s9 }
 0x1ae   : > { %1489 = vrot.lane.b32.xlu1 %v2360_v26, %s2280_s9 }
 0x1b2   : > { %1679 = vrot.lane.b32.xlu1 %v2358_v25, %s2281_s10 }
 0x1b6   : > { %1683 = vrot.lane.b32.xlu1 %v2360_v26, %s2281_s10 }
 0x1ba   : > { %1873 = vrot.lane.b32.xlu1 %v2358_v25, %s2282_s11 }
 0x1be   : > { %1877 = vrot.lane.b32.xlu1 %v2360_v26, %s2282_s11 }
 0x1c2   : > { %2070 = vperm.xlu1 %2259, %v2067_v31  }
 0x1e8   : > { %v403_v32 = vpop.permute.xlu0 %402  ;;  %v399_v33 = vpop.permute.xlu1 %398 }
 0x1ec   : > { %v364_v34 = vpop.permute.xlu1 %363  ;;  %v2405_v35 = vpop.permute.xlu0 %748 }
 0x1f0   : > { %v368_v39 = vpop.permute.xlu1 %367  ;;  %v2416_v40 = vpop.permute.xlu0 %752 }
 0x1f4   : > { %v401_v45 = vpop.permute.xlu1 %400  ;;  %v2437_v47 = vpop.permute.xlu0 %942 }
 0x1f5   : > { %v409_v46 = vsel %vm406_vm2, %v399_v33, %v401_v45  ;;  %v408_v53 = vsel %vm406_vm2, %v401_v45, %v403_v32  ;;  %v960_v45 = vrot.slane %v2414_v38, %v955_v30 }
 0x1f6   : > { %v428_v48 = vmul.f32 %v418_v41, %v409_v46  ;;  %v429_v61 = vmul.f32 %v422_v52, %v408_v53  ;;  %v956_v41 = vrot.slane %v2423_v42, %v955_v30  ;;  %v342_v46 = vld [vmem:[%s2329_s25 + $0x8] sm:$0xf]  ;;  %v968_v53 = vrot.slane %v2428_v43, %v955_v30 }
 0x1f8   : > { %2140 = vmatprep.subr.msk.mxu0 %vm281_vm1, %v428_v48  ;;  %v405_v54 = vpop.permute.xlu1 %404  ;;  %v2453_v62 = vpop.permute.xlu0 %946 }
 0x1f9   : > { %v407_v55 = vsel %vm406_vm2, %v403_v32, %v405_v54  ;;  %v410_v56 = vsel %vm406_vm2, %v405_v54, %v399_v33  ;;  %v1306_v54 = vsub.s32 5, %v2355_v14 }
 0x1fa   : > { %v427_v57 = vmul.f32 %v414_v49, %v410_v56  ;;  %v430_v58 = vmul.f32 %v426_v50, %v407_v55  ;;  %v964_v49 = vrot.slane %v2433_v44, %v955_v30  ;;  %v345_v30 = vld [vmem:[%s2329_s25 + $0x14] sm:$0xf] }
 0x1fb   : > { %v1315_v4 = vrot.slane %v2433_v44, %v1306_v54 }
 0x1fc   : > { %2141 = vmatpush1.msk.msra.mxu0 %vm281_vm1, %v427_v57  ;;  %2143 = vmatprep.subr.msk.mxu1 %vm281_vm1, %v430_v58  ;;  %v366_v63 = vpop.permute.xlu1 %365  ;;  %v2476_v10 = vpop.permute.xlu0 %1293 }
 0x1fd   : > { %v376_v0 = vsel %vm373_vm3, %v364_v34, %v366_v63  ;;  %2142 = vmatmul.mubr.msk.f32.vlgmr.msra.gmra.mrb[0].mxu0 %vm431_vm4, %v341_v60  ;;  %2144 = vmatpush1.msk.msra.mxu1 %vm281_vm1, %v429_v61  ;;  %v375_v6 = vsel %vm373_vm3, %v366_v63, %v368_v39  ;;  %v343_v61 = vld [vmem:[%s2329_s25 + $0xc] sm:$0xf] }
 0x1fe   : > { %v395_v1 = vmul.f32 %v385_v59, %v376_v0  ;;  %2145 = vmatmul.mubr.msk.f32.vlgmr.msra.gmra.mrb[0].mxu1 %vm431_vm4, %v341_v60  ;;  %668 = vmatprep.mubr.f32.mxu0 %v2277_v28  ;;  %v396_v17 = vmul.f32 %v389_v5, %v375_v6  ;;  %v1319_v60 = vrot.slane %v2428_v43, %v1306_v54 }
 0x1ff   : > { %739 = vmatprep.mubr.f32.mxu1 %v2277_v28 }
 0x200   : > { %2146 = vmatprep.subr.msk.mxu0 %vm281_vm1, %v395_v1  ;;  %v370_v7 = vpop.permute.xlu1 %369  ;;  %v1298_v31 = vpop.permute.xlu0 %1297  ;;  %v1500_v1 = vsub.s32 6, %v2355_v14 }
 0x201   : > { %v374_v8 = vsel %vm373_vm3, %v368_v39, %v370_v7  ;;  %v377_v9 = vsel %vm373_vm3, %v370_v7, %v364_v34 }
 0x202   : > { %v394_v11 = vmul.f32 %v381_v2, %v377_v9  ;;  %v397_v12 = vmul.f32 %v393_v3, %v374_v8  ;;  %v1307_v2 = vrot.slane %v2423_v42, %v1306_v54  ;;  %v1513_v7 = vrot.slane %v2428_v43, %v1500_v1  ;;  %v344_v8 = vld [vmem:[%s2329_s25 + $0x10] sm:$0xf] }
 0x204   : > { %2147 = vmatpush1.msk.msra.mxu0 %vm281_vm1, %v394_v11  ;;  %2149 = vmatprep.subr.msk.mxu1 %vm281_vm1, %v397_v12  ;;  %v747_v18 = vpop.permute.xlu1 %746  ;;  %v2519_v50 = vpop.permute.xlu0 %1487 }
 0x205   : > { %v757_v19 = vsel %vm754_vm5, %v747_v18, %v2405_v35  ;;  %v758_v20 = vsel %vm754_vm5, %v2416_v40, %v747_v18  ;;  %2148 = vmatmul.mubr.msk.f32.vlgmr.msra.gmra.mrb[0].mxu0 %vm431_vm4, %v340_v16  ;;  %2150 = vmatpush1.msk.msra.mxu1 %vm281_vm1, %v396_v17  ;;  %v1501_v18 = vrot.slane %v2423_v42, %v1500_v1 }
 0x206   : > { %v775_v22 = vmul.f32 %v762_v13, %v758_v20  ;;  %v776_v23 = vmul.f32 %v766_v15, %v757_v19  ;;  %2151 = vmatmul.mubr.msk.f32.vlgmr.msra.gmra.mrb[0].mxu1 %vm431_vm4, %v340_v16  ;;  %858 = vmatprep.mubr.f32.mxu0 %v2277_v28  ;;  %v1505_v15 = vrot.slane %v2414_v38, %v1500_v1  ;;  %v1694_v16 = vsub.s32 7, %v2355_v14 }
 0x207   : > { %929 = vmatprep.mubr.f32.mxu1 %v2277_v28 }
 0x208   : > { %2152 = vmatprep.subr.msk.mxu0 %vm281_vm1, %v776_v23  ;;  %v751_v32 = vpop.permute.xlu1 %750  ;;  %v1492_v63 = vpop.permute.xlu0 %1491 }
 0x209   : > { %v755_v33 = vsel %vm754_vm5, %v751_v32, %v2416_v40  ;;  %v756_v34 = vsel %vm754_vm5, %v2405_v35, %v751_v32  ;;  %2153 = vmatpush1.msk.msra.mxu0 %vm281_vm1, %v775_v22 }
 0x20a   : > { %v777_v37 = vmul.f32 %v770_v21, %v756_v34  ;;  %v778_v39 = vmul.f32 %v774_v24, %v755_v33  ;;  %v1509_v21 = vrot.slane %v2433_v44, %v1500_v1  ;;  %v1707_v24 = vrot.slane %v2428_v43, %v1694_v16 }
 0x20b   : > { %v1699_v43 = vrot.slane %v2414_v38, %v1694_v16 }
 0x20c   : > { %2155 = vmatprep.subr.msk.mxu1 %vm281_vm1, %v778_v39  ;;  %v941_v48 = vpop.permute.xlu1 %940  ;;  %v1682_v5 = vpop.permute.xlu0 %1681 }
 0x20d   : > { %v951_v40 = vsel %vm948_vm6, %v941_v48, %v2437_v47  ;;  %v952_v35 = vsel %vm948_vm6, %v2453_v62, %v941_v48  ;;  %2154 = vmatmul.mubr.msk.f32.vlgmr.msra.gmra.mrb[0].mxu0 %vm431_vm4, %v342_v46  ;;  %2156 = vmatpush1.msk.msra.mxu1 %vm281_vm1, %v777_v37  ;;  %v1703_v48 = vrot.slane %v2433_v44, %v1694_v16 }
 0x20e   : > { %v969_v51 = vmul.f32 %v956_v41, %v952_v35  ;;  %v970_v52 = vmul.f32 %v960_v45, %v951_v40  ;;  %2157 = vmatmul.mubr.msk.f32.vlgmr.msra.gmra.mrb[0].mxu1 %vm431_vm4, %v342_v46  ;;  %1052 = vmatprep.mubr.f32.mxu0 %v2277_v28  ;;  %v1695_v41 = vrot.slane %v2423_v42, %v1694_v16  ;;  %v346_v42 = vld [vmem:[%s2329_s25 + $0x18] sm:$0xf] }
 0x20f   : > { %1123 = vmatprep.mubr.f32.mxu1 %v2277_v28 }
 0x210   : > { %2158 = vmatprep.subr.msk.mxu0 %vm281_vm1, %v970_v52  ;;  %v945_v55 = vpop.permute.xlu1 %944  ;;  %v1686_v17 = vpop.permute.xlu0 %1685 }
 0x211   : > { %v949_v56 = vsel %vm948_vm6, %v945_v55, %v2453_v62  ;;  %v950_v57 = vsel %vm948_vm6, %v2437_v47, %v945_v55  ;;  %2159 = vmatpush1.msk.msra.mxu0 %vm281_vm1, %v969_v51  ;;  %v2189_v55 = vld [vmem:[%s2665_s1 + $0x28] ss:$0 sm:$0xff] }
 0x212   : > { %v971_v58 = vmul.f32 %v964_v49, %v950_v57  ;;  %v972_v59 = vmul.f32 %v968_v53, %v949_v56  ;;  %2164 = vmatprep.subr.msk.mxu0 %vm281_vm1, %v2366_v27  ;;  %v1311_v27 = vrot.slane %v2414_v38, %v1306_v54  ;;  %v2191_v49 = vld [vmem:[%s2665_s1 + $0x38] ss:$0 sm:$0xff]  ;;  %v2188_v57 = vld [vmem:[%s2665_s1 + $0x20] ss:$0 sm:$0xff] }
 0x214   : > { %2161 = vmatprep.subr.msk.mxu1 %vm281_vm1, %v972_v59  ;;  %v1292_v62 = vpop.permute.xlu1 %1291  ;;  %v1876_v37 = vpop.permute.xlu0 %1875 }
 0x215   : > { %v1303_v0 = vsel %vm1299_vm7, %v1298_v31, %v1292_v62  ;;  %2160 = vmatmul.mubr.msk.f32.vlgmr.msra.gmra.mrb[0].mxu0 %vm431_vm4, %v343_v61  ;;  %2162 = vmatpush1.msk.msra.mxu1 %vm281_vm1, %v971_v58 }
 0x216   : > { %v1323_v47 = vmul.f32 %v1319_v60, %v1303_v0  ;;  %2165 = vmatpush1.msk.msra.mxu0 %vm281_vm1, %v2358_v25  ;;  %2163 = vmatmul.mubr.msk.f32.vlgmr.msra.gmra.mrb[0].mxu1 %vm431_vm4, %v343_v61  ;;  %v1302_v25 = vsel %vm1299_vm7, %v1292_v62, %v2476_v10  ;;  %v2190_v60 = vld [vmem:[%s2665_s1 + $0x30] ss:$0 sm:$0xff]  ;;  %v347_v62 = vld [vmem:[%s2329_s25 + $0x1c] sm:$0xf] }
 0x217   : > { %2167 = vmatprep.subr.msk.mxu1 %vm281_vm1, %v2374_v29  ;;  %1209 = vmatprep.mubr.f32.mxu0 %v2277_v28  ;;  %v1320_v9 = vmul.f32 %v1307_v2, %v1302_v25 }
 0x218   : > { %2168 = vmatpush1.msk.msra.mxu1 %vm281_vm1, %v2360_v26  ;;  %v1296_v3 = vpop.permute.xlu1 %1295  ;;  %1280 = vmatprep.mubr.f32.mxu1 %v2277_v28 }
 0x219   : > { %2173 = vmatprep.subr.msk.mxu1 %vm281_vm1, %v1323_v47  ;;  %v1301_v29 = vsel %vm1299_vm7, %v2476_v10, %v1296_v3  ;;  %v1300_v6 = vsel %vm1299_vm7, %v1296_v3, %v1298_v31 }
 0x21a   : > { %v1321_v26 = vmul.f32 %v1311_v27, %v1301_v29  ;;  %v1322_v12 = vmul.f32 %v1315_v4, %v1300_v6 }
 0x21c   : > { %2170 = vmatprep.subr.msk.mxu0 %vm281_vm1, %v1321_v26  ;;  %v1486_v11 = vpop.permute.xlu1 %1485 }
 0x21d   : > { %v1497_v13 = vsel %vm1493_vm8, %v1492_v63, %v1486_v11  ;;  %2166 = vmatmul.mubr.msk.f32.vlgmr.msra.gmra.mrb[0].mxu0 %vm431_vm4, %v344_v8  ;;  %v1496_v20 = vsel %vm1493_vm8, %v1486_v11, %v2519_v50 }
 0x21e   : > { %v1517_v10 = vmul.f32 %v1513_v7, %v1497_v13  ;;  %2171 = vmatpush1.msk.msra.mxu0 %vm281_vm1, %v1320_v9  ;;  %2169 = vmatmul.mubr.msk.f32.vlgmr.msra.gmra.mrb[0].mxu1 %vm431_vm4, %v344_v8  ;;  %v1514_v31 = vmul.f32 %v1501_v18, %v1496_v20 }
 0x21f   : > { %2174 = vmatpush1.msk.msra.mxu1 %vm281_vm1, %v1322_v12  ;;  %1403 = vmatprep.mubr.f32.mxu0 %v2277_v28 }
 0x220   : > { %2179 = vmatprep.subr.msk.mxu1 %vm281_vm1, %v1517_v10  ;;  %v1490_v19 = vpop.permute.xlu1 %1489  ;;  %1474 = vmatprep.mubr.f32.mxu1 %v2277_v28 }
 0x221   : > { %v1495_v14 = vsel %vm1493_vm8, %v2519_v50, %v1490_v19  ;;  %v1494_v22 = vsel %vm1493_vm8, %v1490_v19, %v1492_v63  ;;  %v1880_v50 = vpop.permute.xlu0 %1879 }
 0x222   : > { %v1515_v23 = vmul.f32 %v1505_v15, %v1495_v14  ;;  %v1516_v33 = vmul.f32 %v1509_v21, %v1494_v22 }
 0x224   : > { %2176 = vmatprep.subr.msk.mxu0 %vm281_vm1, %v1515_v23  ;;  %v1680_v32 = vpop.permute.xlu1 %1679 }
 0x225   : > { %v1691_v34 = vsel %vm1687_vm9, %v1686_v17, %v1680_v32  ;;  %2172 = vmatmul.mubr.msk.f32.vlgmr.msra.gmra.mrb[0].mxu0 %vm431_vm4, %v345_v30  ;;  %v1690_v46 = vsel %vm1687_vm9, %v1680_v32, %v1682_v5 }
 0x226   : > { %v1711_v39 = vmul.f32 %v1707_v24, %v1691_v34  ;;  %2177 = vmatpush1.msk.msra.mxu0 %vm281_vm1, %v1514_v31  ;;  %2175 = vmatmul.mubr.msk.f32.vlgmr.msra.gmra.mrb[0].mxu1 %vm431_vm4, %v345_v30  ;;  %v1708_v51 = vmul.f32 %v1695_v41, %v1690_v46 }
 0x227   : > { %2180 = vmatpush1.msk.msra.mxu1 %vm281_vm1, %v1516_v33  ;;  %1597 = vmatprep.mubr.f32.mxu0 %v2277_v28 }
 0x228   : > { %2185 = vmatprep.subr.msk.mxu1 %vm281_vm1, %v1711_v39  ;;  %v1684_v45 = vpop.permute.xlu1 %1683  ;;  %1668 = vmatprep.mubr.f32.mxu1 %v2277_v28 }
 0x229   : > { %v1689_v40 = vsel %vm1687_vm9, %v1682_v5, %v1684_v45  ;;  %v1688_v38 = vsel %vm1687_vm9, %v1684_v45, %v1686_v17 }
 0x22a   : > { %v1709_v35 = vmul.f32 %v1699_v43, %v1689_v40  ;;  %v1710_v44 = vmul.f32 %v1703_v48, %v1688_v38 }
 0x22c   : > { %2182 = vmatprep.subr.msk.mxu0 %vm281_vm1, %v1709_v35  ;;  %v1874_v52 = vpop.permute.xlu1 %1873 }
 0x22d   : > { %v1885_v53 = vsel %vm1881_vm10, %v1880_v50, %v1874_v52  ;;  %2178 = vmatmul.mubr.msk.f32.vlgmr.msra.gmra.mrb[0].mxu0 %vm431_vm4, %v346_v42  ;;  %v1884_v58 = vsel %vm1881_vm10, %v1874_v52, %v1876_v37 }
 0x22e   : > { %v1905_v54 = vmul.f32 %v2191_v49, %v1885_v53  ;;  %2183 = vmatpush1.msk.msra.mxu0 %vm281_vm1, %v1708_v51  ;;  %2181 = vmatmul.mubr.msk.f32.vlgmr.msra.gmra.mrb[0].mxu1 %vm431_vm4, %v346_v42  ;;  %v1902_v0 = vmul.f32 %v2188_v57, %v1884_v58 }
 0x22f   : > { %2186 = vmatpush1.msk.msra.mxu1 %vm281_vm1, %v1710_v44  ;;  %1791 = vmatprep.mubr.f32.mxu0 %v2277_v28 }
 0x230   : > { %2195 = vmatprep.subr.msk.mxu1 %vm281_vm1, %v1905_v54  ;;  %v1878_v56 = vpop.permute.xlu1 %1877  ;;  %1862 = vmatprep.mubr.f32.mxu1 %v2277_v28 }
 0x231   : > { %v1883_v59 = vsel %vm1881_vm10, %v1876_v37, %v1878_v56  ;;  %v1882_v61 = vsel %vm1881_vm10, %v1878_v56, %v1880_v50 }
 0x232   : > { %v1903_v63 = vmul.f32 %v2189_v55, %v1883_v59  ;;  %v1904_v47 = vmul.f32 %v2190_v60, %v1882_v61 }
 0x234   : > { %2192 = vmatprep.subr.msk.mxu0 %vm281_vm1, %v1903_v63 }
 0x235   : > { %2184 = vmatmul.mubr.msk.f32.vlgmr.msra.gmra.mrb[0].mxu0 %vm431_vm4, %v347_v62 }
 0x236   : > { %2193 = vmatpush1.msk.msra.mxu0 %vm281_vm1, %v1902_v0  ;;  %2187 = vmatmul.mubr.msk.f32.vlgmr.msra.gmra.mrb[0].mxu1 %vm431_vm4, %v347_v62 }
 0x237   : > { %2196 = vmatpush1.msk.msra.mxu1 %vm281_vm1, %v1904_v47  ;;  %1985 = vmatprep.mubr.f32.mxu0 %v2277_v28 }
 0x238   : > { %2056 = vmatprep.mubr.f32.mxu1 %v2277_v28 }
 0x23d   : > { %2194 = vmatmul.mubr.msk.f32.vlgmr.msra.gmra.mrb[0].mxu0 %vm431_vm4, %v348_v36 }
 0x23e   : > { %2197 = vmatmul.mubr.msk.f32.vlgmr.msra.gmra.mrb[0].mxu1 %vm431_vm4, %v348_v36 }
 0x241   : > { %v2071_v27 = vpop.permute.xlu1 %2070 }
 0x310   : > { %v1987_v1 = vpop.f32.mrb[0].mxu0 }
 0x311   : > { %v2073_v2 = vadd.f32 %v2071_v27, %v1987_v1  ;;  %v1989_v3 = vpop.f32.mrb[1].mxu0  ;;  %v2058_v25 = vpop.f32.mrb[0].mxu1  ;;  %2090 = sbr.rel (%p2198_p5) target bundleno = 792 (0x318), region = 44 }
 0x312   : > { %v2074_v4 = vadd.f32 %v2071_v27, %v1989_v3  ;;  %v2075_v29 = vadd.f32 %v2071_v27, %v2058_v25  ;;  %v2060_v5 = vpop.f32.mrb[1].mxu1 }
 0x313   : > { %v2076_v6 = vadd.f32 %v2071_v27, %v2060_v5 }
 0x314   : > { %v2081_v26 = vcombine.low %v2073_v2, %v2074_v4 }
 0x315   : > { %v2082_v7 = vcombine.low %v2075_v29, %v2076_v6 }
 0x316   : > { %2085 = vst [vmem:[#allocation3] sm:$0xff] %v2081_v26  ;;  %2091 = vst [vmem:[%s2668_s4] sm:$0xff] (!%p2198_p5), %v2081_v26 }
 0x317   : > { %2086 = vst [vmem:[#allocation3 + $0x8] sm:$0xff] %v2082_v7  ;;  %2092 = vst [vmem:[%s2668_s4 + $0x8] sm:$0xff] (!%p2198_p5), %v2082_v7 }
 0x318 PF: > { %s14_s15 = sadd.s32 1, %s2269_s15  }
 0x319   : > { %p11_p6 = scmp.ge.s32.totalorder %s14_s15, 5  }
 0x31b   :  { %13 = sbr.rel (!%p11_p6) target bundleno = 1 (0x1), region = 73 }

</bundles_post_ra>
